<compile_context>
chip_gen: v6e
topology: v6e:2x2x1
jax: 0.10.0
libtpu: 0.0.40
codegen_flags: <defaults>
</compile_context>

<pallas_src>
import jax
import jax.numpy as jnp
from jax.experimental import pallas as pl
from jax.experimental.pallas import tpu as pltpu


def _round_up(v, m):
    return (v + m - 1) // m * m


def _pick_s_tile(s, k9p):
    """Largest lane tile (a multiple of 128 dividing S, or S itself) keeping the
    bf16 (K9p, TS) input block around <=4 MiB so double buffering is v7x-safe."""
    cap = (4 * 1024 * 1024) // max(1, 2 * k9p)
    cap = max(128, (cap // 128) * 128)
    if s <= cap:
        return s
    for ts in range(cap, 127, -128):
        if s % ts == 0:
            return ts
    return s  # no clean 128-multiple divisor: take the whole axis


# --------------------------------------------------------------------------------
# Kernel A: Conv3d(k=3, s=2, p=1) as 3 accumulated GEMMs (one per depth tap)
#           + per-tile InstanceNorm partial statistics.
# --------------------------------------------------------------------------------
def _conv_tap_kernel(x_ref, w_ref, y_ref, s1_ref, s2_ref, acc_ref):
    kd = pl.program_id(3)                      # depth-tap reduction axis (last, "arbitrary")

    @pl.when(kd == 0)
    def _init():
        acc_ref[...] = jnp.zeros_like(acc_ref)

    # (C_out_p, K9p) @ (K9p, TS) -> MXU, bf16 operands, f32 accumulation.
    acc_ref[...] += jnp.dot(w_ref[0], x_ref[0, 0],
                            preferred_element_type=jnp.float32)

    @pl.when(kd == pl.num_programs(3) - 1)
    def _finalize():
        y = acc_ref[...]                       # (C_out_p, TS) f32
        y_ref[0, 0] = y
        # Partial per-channel stats for the two-pass InstanceNorm (lane reduce).
        s1_ref[0, 0] = jnp.sum(y, axis=1, keepdims=True)
        s2_ref[0, 0] = jnp.sum(y * y, axis=1, keepdims=True)


# --------------------------------------------------------------------------------
# Kernel B: fused InstanceNorm normalize + LeakyReLU(0.2), lane-dense blocks.
# --------------------------------------------------------------------------------
def _norm_lrelu_kernel(y_ref, mu_ref, rs_ref, o_ref):
    y = (y_ref[...] - mu_ref[...]) * rs_ref[...]
    o_ref[...] = jnp.where(y > 0, y, 0.2 * y)


def _spectral_norm_weight(weight, u, n_power_iterations=1, eps=1e-12):
    """torch spectral_norm forward: power iteration + W / sigma (tiny JAX glue)."""
    c_out = weight.shape[0]
    w_mat = weight.reshape(c_out, -1)                       # (C_out, K)

    def normalize(v):
        return v / (jnp.linalg.norm(v) + eps)

    v = None
    for _ in range(n_power_iterations):
        v = normalize(w_mat.T @ u)
        u = normalize(w_mat @ v)
    sigma = u @ (w_mat @ v)
    return weight / sigma


@jax.jit
def down_conv3d(x, weight, bias, u):
    """DownConv3D forward. x: (N, C_in, D, H, W) f32 -> (N, C_out, Do, Ho, Wo) f32.

    `bias` is accepted for interface parity but not applied: a per-channel bias is
    exactly cancelled by InstanceNorm3d's (affine=False) mean subtraction.
    """
    del bias
    n, c_in, d, h, w = x.shape
    c_out = weight.shape[0]
    do, ho, wo = (d + 1) // 2, (h + 1) // 2, (w + 1) // 2
    s = ho * wo                                # flattened H*W output plane (lane axis)
    k9 = c_in * 9                              # contraction dim per depth tap
    k9p = _round_up(k9, 16)                    # sublane-aligned for bf16
    c_out_p = _round_up(c_out, 8)

    # ---- host-side glue (O(1x) data movement, no FLOPs) --------------------------
    w_sn = _spectral_norm_weight(weight, u)                           # (C_out, C_in, 3,3,3)
    w_taps = jnp.transpose(w_sn, (2, 0, 1, 3, 4)).reshape(3, c_out, k9)
    w_taps = jnp.pad(w_taps, ((0, 0), (0, c_out_p - c_out), (0, k9p - k9)))
    w_taps = w_taps.astype(jnp.bfloat16)                              # (3, C_out_p, K9p)

    xb = x.astype(jnp.bfloat16)
    xp = jnp.pad(xb, ((0, 0), (0, 0), (1, 1), (1, 1), (1, 1)))        # (N, C, D+2, H+2, W+2)
    dp = d + 2
    # Gather only the 9 H/W taps; depth taps stay implicit (kernel index_map).
    taps = [xp[:, :, :, kh:kh + 2 * ho - 1:2, kw:kw + 2 * wo - 1:2]
            for kh in range(3) for kw in range(3)]                    # each (N, C, Dp, Ho, Wo)
    xcol = jnp.stack(taps, axis=2)                                    # (N, C, 9, Dp, Ho, Wo)
    xcol = xcol.transpose(0, 3, 1, 2, 4, 5).reshape(n, dp, k9, s)
    xcol = jnp.pad(xcol, ((0, 0), (0, 0), (0, k9p - k9), (0, 0)))     # (N, Dp, K9p, S) bf16

    ts = _pick_s_tile(s, k9p)
    n_s = s // ts

    # ---- kernel A: conv as 3 accumulated GEMMs + partial stats -------------------
    flops_a = 2 * n * do * s * c_out_p * k9p * 3
    bytes_a = int(1.5 * xcol.size * 2 + w_taps.size * 2
                  + n * do * (c_out_p * s + 2 * c_out_p) * 4)

    y, s1, s2 = pl.pallas_call(
        _conv_tap_kernel,
        out_shape=(
            jax.ShapeDtypeStruct((n, do, c_out_p, s), jnp.float32),
            jax.ShapeDtypeStruct((n, do * n_s, c_out_p, 1), jnp.float32),
            jax.ShapeDtypeStruct((n, do * n_s, c_out_p, 1), jnp.float32),
        ),
        grid_spec=pltpu.PrefetchScalarGridSpec(
            num_scalar_prefetch=0,
            grid=(n, do, n_s, 3),
            in_specs=[
                # Depth tap ki reads padded-input depth slice 2*di + ki.
                pl.BlockSpec((1, 1, k9p, ts),
                             lambda ni, di, si, ki: (ni, 2 * di + ki, 0, si)),
                pl.BlockSpec((1, c_out_p, k9p),
                             lambda ni, di, si, ki: (ki, 0, 0)),
            ],
            out_specs=[
                pl.BlockSpec((1, 1, c_out_p, ts),
                             lambda ni, di, si, ki: (ni, di, 0, si)),
                pl.BlockSpec((1, 1, c_out_p, 1),
                             lambda ni, di, si, ki: (ni, di * n_s + si, 0, 0)),
                pl.BlockSpec((1, 1, c_out_p, 1),
                             lambda ni, di, si, ki: (ni, di * n_s + si, 0, 0)),
            ],
            scratch_shapes=[pltpu.VMEM((c_out_p, ts), jnp.float32)],
        ),
        compiler_params=pltpu.CompilerParams(
            dimension_semantics=("parallel", "parallel", "parallel", "arbitrary"),
            vmem_limit_bytes=48 * 1024 * 1024,
        ),
        cost_estimate=pl.CostEstimate(flops=flops_a, transcendentals=0,
                                      bytes_accessed=bytes_a),
    )(xcol, w_taps)

    # ---- tiny cross-tile reduction for InstanceNorm statistics (jnp glue) --------
    cnt = jnp.float32(do * s)
    mean = jnp.sum(s1, axis=1)[..., 0] / cnt                          # (N, C_out_p)
    ex2 = jnp.sum(s2, axis=1)[..., 0] / cnt
    var = jnp.maximum(ex2 - mean * mean, 0.0)                         # biased variance
    inv_std = jax.lax.rsqrt(var + 1e-5)

    rows = n * do
    y2 = y.reshape(rows, c_out_p, s)
    mu_b = jnp.broadcast_to(mean[:, None, :], (n, do, c_out_p)).reshape(rows, c_out_p, 1)
    rs_b = jnp.broadcast_to(inv_std[:, None, :], (n, do, c_out_p)).reshape(rows, c_out_p, 1)

    row_bytes = c_out_p * s * 4
    tb = max(1, min(rows, (4 * 1024 * 1024) // max(1, row_bytes)))
    while rows % tb:
        tb -= 1

    # ---- kernel B: fused normalize + LeakyReLU ------------------------------------
    out2 = pl.pallas_call(
        _norm_lrelu_kernel,
        out_shape=jax.ShapeDtypeStruct((rows, c_out_p, s), jnp.float32),
        grid_spec=pltpu.PrefetchScalarGridSpec(
            num_scalar_prefetch=0,
            grid=(rows // tb,),
            in_specs=[
                pl.BlockSpec((tb, c_out_p, s), lambda i: (i, 0, 0)),
                pl.BlockSpec((tb, c_out_p, 1), lambda i: (i, 0, 0)),
                pl.BlockSpec((tb, c_out_p, 1), lambda i: (i, 0, 0)),
            ],
            out_specs=pl.BlockSpec((tb, c_out_p, s), lambda i: (i, 0, 0)),
        ),
        compiler_params=pltpu.CompilerParams(
            dimension_semantics=("parallel",),
            vmem_limit_bytes=48 * 1024 * 1024,
        ),
        cost_estimate=pl.CostEstimate(flops=4 * rows * c_out_p * s, transcendentals=0,
                                      bytes_accessed=int(2.1 * rows * c_out_p * s * 4)),
    )(y2, mu_b, rs_b)

    # Back to NCDHW; this transpose only touches the (8x smaller) output.
    out = out2.reshape(n, do, c_out_p, s)[:, :, :c_out, :]
    out = out.transpose(0, 2, 1, 3).reshape(n, c_out, do, ho, wo)
    return out


if __name__ == "__main__":
    key = jax.random.PRNGKey(0)
    k_x, k_w, k_b, k_u = jax.random.split(key, 4)

    N, C_in, C_out = 2, 4, 8
    D = H = W = 8

    x = jax.random.normal(k_x, (N, C_in, D, H, W), dtype=jnp.float32)

    # Deterministic synthetic params (Conv3d-style uniform init on fan_in = C_in*27).
    fan_in = C_in * 27
    bound = 1.0 / (fan_in ** 0.5)
    weight = jax.random.uniform(k_w, (C_out, C_in, 3, 3, 3), jnp.float32, -bound, bound)
    bias = jax.random.uniform(k_b, (C_out,), jnp.float32, -bound, bound)
    # spectral_norm's left singular vector estimate `u`, normalized as in torch.
    u0 = jax.random.normal(k_u, (C_out,), jnp.float32)
    u0 = u0 / (jnp.linalg.norm(u0) + 1e-12)

    y = down_conv3d(x, weight, bias, u0)
    jax.block_until_ready(y)
    assert y.shape == (N, C_out, D // 2, H // 2, W // 2)
    assert bool(jnp.all(jnp.isfinite(y)))
    print("KERNEL_OK")
</pallas_src>

<mosaic_0001>
module attributes {stable_mosaic.version = 11 : i64} {
  func.func @_conv_tap_kernel(%arg0: i32, %arg1: i32, %arg2: i32, %arg3: i32, %arg4: memref<1x1x48x16xbf16, #tpu.memory_space<vmem>>, %arg5: memref<1x8x48xbf16, #tpu.memory_space<vmem>>, %arg6: memref<1x1x8x16xf32, #tpu.memory_space<vmem>>, %arg7: memref<1x1x8x1xf32, #tpu.memory_space<vmem>>, %arg8: memref<1x1x8x1xf32, #tpu.memory_space<vmem>>, %arg9: memref<8x16xf32, #tpu.memory_space<vmem>>) attributes {dimension_semantics = [#tpu.dimension_semantics<parallel>, #tpu.dimension_semantics<parallel>, #tpu.dimension_semantics<parallel>, #tpu.dimension_semantics<arbitrary>], iteration_bounds = array<i64: 2, 4, 1, 3>, scalar_prefetch = 0 : i64, scratch_operands = 1 : i64, tpu.core_type = #tpu.core_type<tc>, window_params = [{transform_indices = @transform_0, window_bounds = array<i64: 1, 1, 48, 16>}, {transform_indices = @transform_1, window_bounds = array<i64: 1, 8, 48>}, {transform_indices = @transform_2, window_bounds = array<i64: 1, 1, 8, 16>}, {transform_indices = @transform_3, window_bounds = array<i64: 1, 1, 8, 1>}, {transform_indices = @transform_4, window_bounds = array<i64: 1, 1, 8, 1>}]} {
    %c0_i32 = arith.constant 0 : i32
    %0 = arith.cmpi eq, %arg3, %c0_i32 : i32
    %1 = arith.extui %0 : i1 to i32
    %c0_i32_0 = arith.constant 0 : i32
    %2 = arith.cmpi ne, %1, %c0_i32_0 : i32
    scf.if %2 {
      %cst_12 = arith.constant 0.000000e+00 : f32
      %14 = vector.broadcast %cst_12 : f32 to vector<8x16xf32>
      %c0_13 = arith.constant 0 : index
      %c0_14 = arith.constant 0 : index
      %15 = vector.load %arg9[%c0_13, %c0_14] : memref<8x16xf32, #tpu.memory_space<vmem>>, vector<8x16xf32>
      tpu.vector_store %arg9[%c0_13, %c0_14], %14 {strides = array<i32>} : memref<8x16xf32, #tpu.memory_space<vmem>>, vector<8x16xf32>,
    } else {
    }
    %c0 = arith.constant 0 : index
    %c0_1 = arith.constant 0 : index
    %3 = vector.load %arg9[%c0, %c0_1] : memref<8x16xf32, #tpu.memory_space<vmem>>, vector<8x16xf32>
    %c0_2 = arith.constant 0 : index
    %c0_3 = arith.constant 0 : index
    %c0_4 = arith.constant 0 : index
    %4 = vector.load %arg5[%c0_2, %c0_3, %c0_4] : memref<1x8x48xbf16, #tpu.memory_space<vmem>>, vector<1x8x48xbf16>
    %5 = vector.shape_cast %4 : vector<1x8x48xbf16> to vector<8x48xbf16>
    %c0_5 = arith.constant 0 : index
    %c0_6 = arith.constant 0 : index
    %c0_7 = arith.constant 0 : index
    %c0_8 = arith.constant 0 : index
    %6 = vector.load %arg4[%c0_5, %c0_6, %c0_7, %c0_8] : memref<1x1x48x16xbf16, #tpu.memory_space<vmem>>, vector<1x1x48x16xbf16>
    %7 = vector.shape_cast %6 : vector<1x1x48x16xbf16> to vector<48x16xbf16>
    %cst = arith.constant dense<0.000000e+00> : vector<8x16xf32>
    %8 = tpu.matmul %5, %7, %cst {dimension_numbers = #tpu.dot_dimension_numbers<[1], [0], [0], [1], [0, 0, 1, 1], [], []>} : vector<8x48xbf16>, vector<48x16xbf16>, vector<8x16xf32> -> vector<8x16xf32>
    %9 = arith.addf %3, %8 : vector<8x16xf32>
    %c0_9 = arith.constant 0 : index
    %c0_10 = arith.constant 0 : index
    %10 = vector.load %arg9[%c0_9, %c0_10] : memref<8x16xf32, #tpu.memory_space<vmem>>, vector<8x16xf32>
    tpu.vector_store %arg9[%c0_9, %c0_10], %9 {strides = array<i32>} : memref<8x16xf32, #tpu.memory_space<vmem>>, vector<8x16xf32>,
    %c2_i32 = arith.constant 2 : i32
    %11 = arith.cmpi eq, %arg3, %c2_i32 : i32
    %12 = arith.extui %11 : i1 to i32
    %c0_i32_11 = arith.constant 0 : i32
    %13 = arith.cmpi ne, %12, %c0_i32_11 : i32
    scf.if %13 {
      %c0_12 = arith.constant 0 : index
      %c0_13 = arith.constant 0 : index
      %14 = vector.load %arg9[%c0_12, %c0_13] : memref<8x16xf32, #tpu.memory_space<vmem>>, vector<8x16xf32>
      %c0_14 = arith.constant 0 : index
      %c0_15 = arith.constant 0 : index
      %c0_16 = arith.constant 0 : index
      %c0_17 = arith.constant 0 : index
      %15 = vector.load %arg6[%c0_14, %c0_15, %c0_16, %c0_17] : memref<1x1x8x16xf32, #tpu.memory_space<vmem>>, vector<1x1x8x16xf32>
      %16 = vector.shape_cast %15 : vector<1x1x8x16xf32> to vector<8x16xf32>
      %17 = vector.shape_cast %14 : vector<8x16xf32> to vector<1x1x8x16xf32>
      tpu.vector_store %arg6[%c0_14, %c0_15, %c0_16, %c0_17], %17 {strides = array<i32>} : memref<1x1x8x16xf32, #tpu.memory_space<vmem>>, vector<1x1x8x16xf32>,
      %cst_18 = arith.constant dense<0.000000e+00> : vector<8xf32>
      %18 = vector.multi_reduction <add>, %14, %cst_18 [1] : vector<8x16xf32> to vector<8xf32>
      %19 = vector.shape_cast %18 : vector<8xf32> to vector<8x1xf32>
      %c0_19 = arith.constant 0 : index
      %c0_20 = arith.constant 0 : index
      %c0_21 = arith.constant 0 : index
      %c0_22 = arith.constant 0 : index
      %20 = vector.load %arg7[%c0_19, %c0_20, %c0_21, %c0_22] : memref<1x1x8x1xf32, #tpu.memory_space<vmem>>, vector<1x1x8x1xf32>
      %21 = vector.shape_cast %20 : vector<1x1x8x1xf32> to vector<8x1xf32>
      %22 = vector.shape_cast %19 : vector<8x1xf32> to vector<1x1x8x1xf32>
      tpu.vector_store %arg7[%c0_19, %c0_20, %c0_21, %c0_22], %22 {strides = array<i32>} : memref<1x1x8x1xf32, #tpu.memory_space<vmem>>, vector<1x1x8x1xf32>,
      %23 = arith.mulf %14, %14 : vector<8x16xf32>
      %cst_23 = arith.constant dense<0.000000e+00> : vector<8xf32>
      %24 = vector.multi_reduction <add>, %23, %cst_23 [1] : vector<8x16xf32> to vector<8xf32>
      %25 = vector.shape_cast %24 : vector<8xf32> to vector<8x1xf32>
      %c0_24 = arith.constant 0 : index
      %c0_25 = arith.constant 0 : index
      %c0_26 = arith.constant 0 : index
      %c0_27 = arith.constant 0 : index
      %26 = vector.load %arg8[%c0_24, %c0_25, %c0_26, %c0_27] : memref<1x1x8x1xf32, #tpu.memory_space<vmem>>, vector<1x1x8x1xf32>
      %27 = vector.shape_cast %26 : vector<1x1x8x1xf32> to vector<8x1xf32>
      %28 = vector.shape_cast %25 : vector<8x1xf32> to vector<1x1x8x1xf32>
      tpu.vector_store %arg8[%c0_24, %c0_25, %c0_26, %c0_27], %28 {strides = array<i32>} : memref<1x1x8x1xf32, #tpu.memory_space<vmem>>, vector<1x1x8x1xf32>,
    } else {
    }
    return
  }
  func.func @transform_0(%arg0: i32, %arg1: i32, %arg2: i32, %arg3: i32) -> (i32, i32, i32, i32) {
    %c2_i32 = arith.constant 2 : i32
    %0 = arith.muli %c2_i32, %arg1 : i32
    %1 = arith.addi %0, %arg3 : i32
    %c0_i32 = arith.constant 0 : i32
    %c0_i32_0 = arith.constant 0 : i32
    return %arg0, %1, %c0_i32, %arg2 : i32, i32, i32, i32
  }
  func.func @transform_1(%arg0: i32, %arg1: i32, %arg2: i32, %arg3: i32) -> (i32, i32, i32) {
    %c0_i32 = arith.constant 0 : i32
    %c0_i32_0 = arith.constant 0 : i32
    %c0_i32_1 = arith.constant 0 : i32
    return %arg3, %c0_i32, %c0_i32_0 : i32, i32, i32
  }
  func.func @transform_2(%arg0: i32, %arg1: i32, %arg2: i32, %arg3: i32) -> (i32, i32, i32, i32) {
    %c0_i32 = arith.constant 0 : i32
    %c0_i32_0 = arith.constant 0 : i32
    return %arg0, %arg1, %c0_i32, %arg2 : i32, i32, i32, i32
  }
  func.func @transform_3(%arg0: i32, %arg1: i32, %arg2: i32, %arg3: i32) -> (i32, i32, i32, i32) {
    %c1_i32 = arith.constant 1 : i32
    %0 = arith.muli %arg1, %c1_i32 : i32
    %1 = arith.addi %0, %arg2 : i32
    %c0_i32 = arith.constant 0 : i32
    %c0_i32_0 = arith.constant 0 : i32
    %c0_i32_1 = arith.constant 0 : i32
    return %arg0, %1, %c0_i32, %c0_i32_0 : i32, i32, i32, i32
  }
  func.func @transform_4(%arg0: i32, %arg1: i32, %arg2: i32, %arg3: i32) -> (i32, i32, i32, i32) {
    %c1_i32 = arith.constant 1 : i32
    %0 = arith.muli %arg1, %c1_i32 : i32
    %1 = arith.addi %0, %arg2 : i32
    %c0_i32 = arith.constant 0 : i32
    %c0_i32_0 = arith.constant 0 : i32
    %c0_i32_1 = arith.constant 0 : i32
    return %arg0, %1, %c0_i32, %c0_i32_0 : i32, i32, i32, i32
  }
}

module attributes {stable_mosaic.version = 11 : i64} {
  func.func @_norm_lrelu_kernel(%arg0: i32, %arg1: memref<8x8x16xf32, #tpu.memory_space<vmem>>, %arg2: memref<8x8x1xf32, #tpu.memory_space<vmem>>, %arg3: memref<8x8x1xf32, #tpu.memory_space<vmem>>, %arg4: memref<8x8x16xf32, #tpu.memory_space<vmem>>) attributes {dimension_semantics = [#tpu.dimension_semantics<parallel>], iteration_bounds = array<i64: 1>, scalar_prefetch = 0 : i64, scratch_operands = 0 : i64, tpu.core_type = #tpu.core_type<tc>, window_params = [{transform_indices = @transform_0, window_bounds = array<i64: 8, 8, 16>}, {transform_indices = @transform_1, window_bounds = array<i64: 8, 8, 1>}, {transform_indices = @transform_2, window_bounds = array<i64: 8, 8, 1>}, {transform_indices = @transform_3, window_bounds = array<i64: 8, 8, 16>}]} {
    %c0 = arith.constant 0 : index
    %c0_0 = arith.constant 0 : index
    %c0_1 = arith.constant 0 : index
    %0 = vector.load %arg1[%c0, %c0_0, %c0_1] : memref<8x8x16xf32, #tpu.memory_space<vmem>>, vector<8x8x16xf32>
    %c0_2 = arith.constant 0 : index
    %c0_3 = arith.constant 0 : index
    %c0_4 = arith.constant 0 : index
    %1 = vector.load %arg2[%c0_2, %c0_3, %c0_4] : memref<8x8x1xf32, #tpu.memory_space<vmem>>, vector<8x8x1xf32>
    %2 = vector.broadcast %1 : vector<8x8x1xf32> to vector<8x8x16xf32>
    %3 = arith.subf %0, %2 : vector<8x8x16xf32>
    %c0_5 = arith.constant 0 : index
    %c0_6 = arith.constant 0 : index
    %c0_7 = arith.constant 0 : index
    %4 = vector.load %arg3[%c0_5, %c0_6, %c0_7] : memref<8x8x1xf32, #tpu.memory_space<vmem>>, vector<8x8x1xf32>
    %5 = vector.broadcast %4 : vector<8x8x1xf32> to vector<8x8x16xf32>
    %6 = arith.mulf %3, %5 : vector<8x8x16xf32>
    %cst = arith.constant 0.000000e+00 : f32
    %7 = vector.broadcast %cst : f32 to vector<8x8x16xf32>
    %8 = arith.cmpf ogt, %6, %7 : vector<8x8x16xf32>
    %cst_8 = arith.constant 2.000000e-01 : f32
    %9 = vector.broadcast %cst_8 : f32 to vector<8x8x16xf32>
    %10 = arith.mulf %9, %6 : vector<8x8x16xf32>
    %11 = arith.select %8, %6, %10 : vector<8x8x16xi1>, vector<8x8x16xf32>
    %c0_9 = arith.constant 0 : index
    %c0_10 = arith.constant 0 : index
    %c0_11 = arith.constant 0 : index
    %12 = vector.load %arg4[%c0_9, %c0_10, %c0_11] : memref<8x8x16xf32, #tpu.memory_space<vmem>>, vector<8x8x16xf32>
    tpu.vector_store %arg4[%c0_9, %c0_10, %c0_11], %11 {strides = array<i32>} : memref<8x8x16xf32, #tpu.memory_space<vmem>>, vector<8x8x16xf32>,
    return
  }
  func.func @transform_0(%arg0: i32) -> (i32, i32, i32) {
    %c0_i32 = arith.constant 0 : i32
    %c0_i32_0 = arith.constant 0 : i32
    %c0_i32_1 = arith.constant 0 : i32
    return %arg0, %c0_i32, %c0_i32_0 : i32, i32, i32
  }
  func.func @transform_1(%arg0: i32) -> (i32, i32, i32) {
    %c0_i32 = arith.constant 0 : i32
    %c0_i32_0 = arith.constant 0 : i32
    %c0_i32_1 = arith.constant 0 : i32
    return %arg0, %c0_i32, %c0_i32_0 : i32, i32, i32
  }
  func.func @transform_2(%arg0: i32) -> (i32, i32, i32) {
    %c0_i32 = arith.constant 0 : i32
    %c0_i32_0 = arith.constant 0 : i32
    %c0_i32_1 = arith.constant 0 : i32
    return %arg0, %c0_i32, %c0_i32_0 : i32, i32, i32
  }
  func.func @transform_3(%arg0: i32) -> (i32, i32, i32) {
    %c0_i32 = arith.constant 0 : i32
    %c0_i32_0 = arith.constant 0 : i32
    %c0_i32_1 = arith.constant 0 : i32
    return %arg0, %c0_i32, %c0_i32_0 : i32, i32, i32
  }
}

</mosaic_0001>

<bundles_post_ra>
// kernel: down_conv3d.3
= control target key start
LH: loop header
LB: loop body
LE: loop exit
PB: predicated region body
PF: predicated region fallthrough
CT: control target
= control target key end

     0   :  { %v174_v0 = vmov 0   ;;  %vm158_vm0 = vcmask 130048   ;;  %s299_s1 = inlined_call_operand.vmem [shape: f32[8,8,1], index: 1, kind: input, shape index: {}]   ;;  %s300_s2 = inlined_call_operand.vmem [shape: f32[8,8,1], index: 2, kind: input, shape index: {}]   ;;  %s301_s0 = inlined_call_operand.vmem [shape: f32[8,8,16], index: 0, kind: input, shape index: {}]   ;;  %s302_s3 = inlined_call_operand.vmem [shape: f32[8,8,16], index: 3, kind: output, shape index: {}]  }
   0x1   :  { %173 = vset.pattern.permute.xlu1 %v174_v0  ;;  %172 = vset.pattern.permute.xlu0 %v174_v0  ;;  %v24_v1 = vld [vmem:[%s299_s1 + $0x10] sm:$0xff]  ;;  %v22_v2 = vld [vmem:[%s299_s1] sm:$0xff]  ;;  %v25_v3 = vld [vmem:[%s299_s1 + $0x18] sm:$0xff] }
   0x2   :  { %42 = vperm.xlu1 %173, %v24_v1   ;;  %32 = vperm.xlu0 %172, %v22_v2   ;;  %v23_v4 = vld [vmem:[%s299_s1 + $0x8] sm:$0xff]  ;;  %v26_v6 = vld [vmem:[%s299_s1 + $0x20] sm:$0xff]  ;;  %v29_v7 = vld [vmem:[%s299_s1 + $0x38] sm:$0xff] }
   0x3   :  { %v27_v5 = vld [vmem:[%s299_s1 + $0x28] sm:$0xff]  ;;  %v28_v8 = vld [vmem:[%s299_s1 + $0x30] sm:$0xff]  ;;  %v78_v10 = vld [vmem:[%s300_s2] sm:$0xff] }
   0x4   :  { %v79_v9 = vld [vmem:[%s300_s2 + $0x8] sm:$0xff]  ;;  %v81_v11 = vld [vmem:[%s300_s2 + $0x18] sm:$0xff]  ;;  %v80_v12 = vld [vmem:[%s300_s2 + $0x10] sm:$0xff] }
   0x5   :  { %v83_v13 = vld [vmem:[%s300_s2 + $0x28] sm:$0xff]  ;;  %v82_v14 = vld [vmem:[%s300_s2 + $0x20] sm:$0xff]  ;;  %v85_v15 = vld [vmem:[%s300_s2 + $0x38] sm:$0xff] }
   0x6   :  { %47 = vperm.xlu1 %173, %v25_v3   ;;  %37 = vperm.xlu0 %172, %v23_v4   ;;  %v84_v16 = vld [vmem:[%s300_s2 + $0x30] sm:$0xff]  ;;  %v14_v23 = vld [vmem:[%s301_s0] sm:$0xff]  ;;  %v15_v24 = vld [vmem:[%s301_s0 + $0x8] sm:$0xff] }
   0x7   :  { %v16_v27 = vld [vmem:[%s301_s0 + $0x10] sm:$0xff]  ;;  %v17_v29 = vld [vmem:[%s301_s0 + $0x18] sm:$0xff]  ;;  %v19_v37 = vld [vmem:[%s301_s0 + $0x28] sm:$0xff] }
   0x8   :  { %v18_v38 = vld [vmem:[%s301_s0 + $0x20] sm:$0xff]  ;;  %v21_v49 = vld [vmem:[%s301_s0 + $0x38] sm:$0xff]  ;;  %v20_v50 = vld [vmem:[%s301_s0 + $0x30] sm:$0xff] }
   0xa   :  { %57 = vperm.xlu1 %173, %v27_v5   ;;  %52 = vperm.xlu0 %172, %v26_v6  }
   0xe   :  { %67 = vperm.xlu1 %173, %v29_v7   ;;  %62 = vperm.xlu0 %172, %v28_v8  }
  0x12   :  { %93 = vperm.xlu1 %173, %v79_v9   ;;  %88 = vperm.xlu0 %172, %v78_v10  }
  0x16   :  { %103 = vperm.xlu1 %173, %v81_v11   ;;  %98 = vperm.xlu0 %172, %v80_v12  }
  0x1a   :  { %113 = vperm.xlu1 %173, %v83_v13   ;;  %108 = vperm.xlu0 %172, %v82_v14  }
  0x1e   :  { %123 = vperm.xlu1 %173, %v85_v15   ;;  %118 = vperm.xlu0 %172, %v84_v16  }
  0x7d   :  { %v43_v17 = vpop.permute.xlu1 %42  ;;  %v33_v18 = vpop.permute.xlu0 %32 }
  0x7e   :  { %v70_v28 = vsub.f32 %v14_v23, %v33_v18  ;;  %v72_v35 = vsub.f32 %v16_v27, %v43_v17 }
  0x81   :  { %v48_v19 = vpop.permute.xlu1 %47  ;;  %v38_v20 = vpop.permute.xlu0 %37 }
  0x82   :  { %v71_v30 = vsub.f32 %v15_v24, %v38_v20  ;;  %v73_v36 = vsub.f32 %v17_v29, %v48_v19 }
  0x85   :  { %v58_v21 = vpop.permute.xlu1 %57  ;;  %v53_v22 = vpop.permute.xlu0 %52 }
  0x86   :  { %v75_v47 = vsub.f32 %v19_v37, %v58_v21  ;;  %v74_v48 = vsub.f32 %v18_v38, %v53_v22 }
  0x89   :  { %v68_v25 = vpop.permute.xlu1 %67  ;;  %v63_v26 = vpop.permute.xlu0 %62 }
  0x8a   :  { %v77_v59 = vsub.f32 %v21_v49, %v68_v25  ;;  %v76_v60 = vsub.f32 %v20_v50, %v63_v26 }
  0x8d   :  { %v94_v31 = vpop.permute.xlu1 %93  ;;  %v89_v32 = vpop.permute.xlu0 %88 }
  0x8e   :  { %v127_v33 = vmul.f32 %v94_v31, %v71_v30  ;;  %v126_v34 = vmul.f32 %v89_v32, %v70_v28 }
  0x90   :  { %vm135_vm1 = vcmp.gt.f32.partialorder %v127_v33, 0.0  ;;  %v143_v39 = vmul.f32 0.2, %v127_v33  ;;  %vm134_vm2 = vcmp.gt.f32.partialorder %v126_v34, 0.0  ;;  %v142_v40 = vmul.f32 0.2, %v126_v34 }
  0x91   :  { %v104_v41 = vpop.permute.xlu1 %103  ;;  %v99_v42 = vpop.permute.xlu0 %98 }
  0x92   :  { %v151_v43 = vsel %vm135_vm1, %v127_v33, %v143_v39  ;;  %v150_v44 = vsel %vm134_vm2, %v126_v34, %v142_v40  ;;  %v129_v45 = vmul.f32 %v104_v41, %v73_v36  ;;  %v128_v46 = vmul.f32 %v99_v42, %v72_v35 }
  0x93   :  { %160 = vst.msk [vmem:[%s302_s3 + $0x8] sm:$0xff] %vm158_vm0, %v151_v43  ;;  %159 = vst.msk [vmem:[%s302_s3] sm:$0xff] %vm158_vm0, %v150_v44 }
  0x94   :  { %vm137_vm3 = vcmp.gt.f32.partialorder %v129_v45, 0.0  ;;  %v145_v51 = vmul.f32 0.2, %v129_v45  ;;  %vm136_vm4 = vcmp.gt.f32.partialorder %v128_v46, 0.0  ;;  %v144_v52 = vmul.f32 0.2, %v128_v46 }
  0x95   :  { %v114_v53 = vpop.permute.xlu1 %113  ;;  %v109_v54 = vpop.permute.xlu0 %108 }
  0x96   :  { %v153_v55 = vsel %vm137_vm3, %v129_v45, %v145_v51  ;;  %v152_v56 = vsel %vm136_vm4, %v128_v46, %v144_v52  ;;  %v131_v57 = vmul.f32 %v114_v53, %v75_v47  ;;  %v130_v58 = vmul.f32 %v109_v54, %v74_v48 }
  0x97   :  { %162 = vst.msk [vmem:[%s302_s3 + $0x18] sm:$0xff] %vm158_vm0, %v153_v55  ;;  %161 = vst.msk [vmem:[%s302_s3 + $0x10] sm:$0xff] %vm158_vm0, %v152_v56 }
  0x98   :  { %vm139_vm5 = vcmp.gt.f32.partialorder %v131_v57, 0.0  ;;  %v147_v61 = vmul.f32 0.2, %v131_v57  ;;  %vm138_vm6 = vcmp.gt.f32.partialorder %v130_v58, 0.0  ;;  %v146_v62 = vmul.f32 0.2, %v130_v58 }
  0x99   :  { %v124_v63 = vpop.permute.xlu1 %123  ;;  %v119_v0 = vpop.permute.xlu0 %118 }
  0x9a   :  { %v155_v1 = vsel %vm139_vm5, %v131_v57, %v147_v61  ;;  %v154_v2 = vsel %vm138_vm6, %v130_v58, %v146_v62  ;;  %v133_v3 = vmul.f32 %v124_v63, %v77_v59  ;;  %v132_v4 = vmul.f32 %v119_v0, %v76_v60 }
  0x9b   :  { %164 = vst.msk [vmem:[%s302_s3 + $0x28] sm:$0xff] %vm158_vm0, %v155_v1  ;;  %163 = vst.msk [vmem:[%s302_s3 + $0x20] sm:$0xff] %vm158_vm0, %v154_v2 }
  0x9c   :  { %vm141_vm7 = vcmp.gt.f32.partialorder %v133_v3, 0.0  ;;  %v149_v5 = vmul.f32 0.2, %v133_v3  ;;  %vm140_vm8 = vcmp.gt.f32.partialorder %v132_v4, 0.0  ;;  %v148_v6 = vmul.f32 0.2, %v132_v4 }
  0x9e   :  { %v157_v7 = vsel %vm141_vm7, %v133_v3, %v149_v5  ;;  %v156_v8 = vsel %vm140_vm8, %v132_v4, %v148_v6 }
  0x9f   :  { %166 = vst.msk [vmem:[%s302_s3 + $0x38] sm:$0xff] %vm158_vm0, %v157_v7  ;;  %165 = vst.msk [vmem:[%s302_s3 + $0x30] sm:$0xff] %vm158_vm0, %v156_v8 }

// kernel: down_conv3d.2
= control target key start
LH: loop header
LB: loop body
LE: loop exit
PB: predicated region body
PF: predicated region fallthrough
CT: control target
= control target key end

     0   :  { %s853_s15 = smov 0   ;;  %s855_s16 = smov 0   ;;  %s963_s0 = inlined_call_operand.vmem [shape: bf16[2,10,48,16], index: 0, kind: input, shape index: {}]   ;;  %s964_s1 = inlined_call_operand.vmem [shape: bf16[3,8,48], index: 1, kind: input, shape index: {}]   ;;  %s965_s2 = inlined_call_operand.vmem [shape: f32[2,4,8,16], index: 2, kind: output, shape index: {0}]   ;;  %s966_s3 = inlined_call_operand.vmem [shape: f32[2,4,8,1], index: 3, kind: output, shape index: {1}]   ;;  %s967_s4 = inlined_call_operand.vmem [shape: f32[2,4,8,1], index: 4, kind: output, shape index: {2}]  }
   0x1   :  { %s857_s17 = smov 0   ;;  %s859_s18 = smov 0  }
   0x2   :  { %s861_s19 = smov 0   ;;  %s863_s20 = smov 0  }
   0x3   :  { %s865_s21 = smov 0  }
   0x4 LB: > { %s30_s22 = sadd.s32 1, %s811_s18  ;;  %s37_s23 = sadd.s32 1, %s815_s19  ;;  %s823_s21 = sphi %s865_s21, %s15_s21   ;;  %s819_s20 = sphi %s863_s20, %s975_s20   ;;  %s815_s19 = sphi %s861_s19, %s974_s19   ;;  %s811_s18 = sphi %s859_s18, %s973_s18   ;;  %s807_s17 = sphi %s857_s17, %s972_s17   ;;  %s803_s16 = sphi %s855_s16, %s971_s16   ;;  %s799_s15 = sphi %s853_s15, %s970_s15  }
   0x5   : > { %p31_p0 = scmp.ge.s32.totalorder %s30_s22, 3  ;;  %p673_p1 = scmp.ge.s32.totalorder %s823_s21, 1 }
   0x6   : > { %p233_p2 = scmp.lt.s32.totalorder %s823_s21, 25  ;;  %s41_s24 = sadd.s32 1, %s819_s20 }
   0x7   : > { %s977_s22 = smov (%p31_p0, %s30_s22), 0  ;;  %s979_s23 = smov (!%p31_p0, %s37_s23), %s815_s19 }
   0x8   : > { %p234_p3 = pnand %p673_p1, %p233_p2  ;;  %p39_p4 = scmp.ge.s32.totalorder %s979_s23, 4 }
   0x9   : > { %s674_s25 = sshll.u32 (!%p234_p3), %s803_s16, 1  ;;  %p298_p6 = scmp.lt.s32.totalorder (!%p234_p3), %s807_s17, 1 }
   0xa   : > { %s981_s23 = smov (%p39_p4, %s979_s23), 0  ;;  %s983_s24 = smov (!%p39_p4, %s41_s24), %s819_s20 }
   0xb   : > { %p43_p5 = scmp.ge.s32.totalorder %s983_s24, 2  ;;  %237 = sbr.rel (%p234_p3) target bundleno = 392 (0x188), region = 28 }
   0xc   : > { %s297_s26 = sadd.s32 (!%p234_p3), %s799_s15, %s674_s25  ;;  %p312_p7 = scmp.lt.s32.totalorder (!%p234_p3), %s799_s15, 2 }
   0xd   : > { %s985_s24 = smov (%p43_p5, %s983_s24), 0  ;;  %p300_p8 = scmp.lt.s32.totalorder (!%p234_p3), %s297_s26, 9 }
   0xe   : > { %968 = sst [smem:[#allocation3_spill]] %s985_s24  ;;  %p318_p9 = scmp.lt.s32.totalorder (!%p234_p3), %s803_s16, 3 }
   0xf   : > { %p683_p10 = scmp.ne.s32.totalorder (!%p234_p3), %s799_s15, 0 }
  0x10   : > { %s987_s17 = smov (!%p298_p6, %s807_s17), 1  ;;  %s989_s26 = smov (!%p300_p8, %s297_s26), 9 }
  0x11   : > { %s706_s27 = smul.u32 60, %s987_s17  ;;  %s677_s13 = sshll.u32 %s987_s17, 2 }
  0x12   : > { %s313_s28 = scalar_select %p312_p7, %s799_s15, 2 }
  0x13   : > { %s705_s29 = smul.u32 6, %s989_s26  ;;  %s991_s16 = smov (!%p318_p9, %s803_s16), 3 }
  0x14   : > { %s676_s30 = sshll.u32 %s313_s28, 2  ;;  %s324_s14 = sadd.s32 %s677_s13, %s991_s16 }
  0x15   : > { %s307_s5 = sadd.s32 %s706_s27, %s705_s29  ;;  %s315_s8 = scalar_lea.vmem %s964_s1, %s676_s30 }
  0x16   : > { %s675_s9 = sshll.u32 %s307_s5, 2  ;;  %s911_s25 = sshll.u32 %s324_s14, 3 }
  0x17   : > { %s309_s12 = scalar_lea.vmem %s963_s0, %s675_s9  ;;  %s326_s27 = scalar_lea.vmem %s965_s2, %s911_s25 }
  0x18   : > { %s335_s30 = scalar_lea.vmem %s966_s3, %s911_s25  ;;  %s345_s7 = scalar_lea.vmem %s967_s4, %s911_s25 }
  0x19   : > { %351 = sbr.rel (%p683_p10) target bundleno = 32 (0x20), region = 32 }
  0x1e   : > { %vm352_vm0 = vcmask 130048   ;;  %v825_v0 = vmov 0.0  }
  0x1f   : > { %353 = vst.msk [vmem:[#allocation2] sm:$0xff] %vm352_vm0, %v825_v0 }
  0x20 PF: > { %v766_v1 = vld [vmem:[%s309_s12 + $0x10] sm:$0xff]   ;;  %v826_v2 = vmov 0.0   ;;  %v767_v3 = vld [vmem:[%s309_s12 + $0x8] sm:$0xff]   ;;  %vm827_vm1 = vmmov 0   ;;  %v768_v4 = vld [vmem:[%s309_s12] sm:$0xff]   ;;  %vm380_vm2 = vcmask 392192  }
  0x21   : > { %695 = vmatprep.subr.bf16.mxu0 %v826_v2  ;;  %701 = vmatprep.mubr.msk.bf16.mxu0 %vm827_vm1, %v826_v2  ;;  %v355_v5 = vld [vmem:[%s315_s8] sm:$0xf]  ;;  %vm425_vm3 = vcmask 130048   ;;  %p688_p11 = scmp.ne.s32.totalorder %s799_s15, 2 }
  0x22   : > { %696 = vmatpush3.bf16.msra.mxu0 %v766_v1 }
  0x23   : > { %697 = vmatprep.subr.bf16.mxu0 %v826_v2 }
  0x26   : > { %698 = vmatpush3.bf16.msra.mxu0 %v767_v3  ;;  %v354_v6 = vld [vmem:[#allocation2] sm:$0xff] }
  0x27   : > { %699 = vmatprep.subr.bf16.mxu0 %v826_v2 }
  0x2a   : > { %700 = vmatpush3.bf16.msra.mxu0 %v768_v4 }
  0x2d   : > { %702 = vmatmul.mubr.msk.bf16.vlgmr.msra.gmra.mxu0 %vm380_vm2, %v355_v5 }
  0xed   : > { %v418_v7 = vpop.f32.mrf.mxu0 }
  0xee   : > { %v424_v8 = vadd.f32 %v418_v7, %v354_v6 }
  0xef   : > { %v703_v9 = vpop.f32.mrf.mxu0  ;;  %430 = sbr.rel (%p688_p11) target bundleno = 392 (0x188), region = 36 }
  0xf0   : > { %426 = vst.msk [vmem:[#allocation2] sm:$0xff] %vm425_vm3, %v424_v8 }
  0xf1   : > { %v421_v10 = vpop.f32.mrf.mxu0 }
  0xf3   : > { %v704_v11 = vpop.f32.mrf.mxu0 }
  0xf4   : > { %vm436_vm4 = vcmask 7168  }
  0xf7   : > { %v431_v12 = vld [vmem:[#allocation2] sm:$0xff] }
  0xf8   : > { %v433_v13 = vsel %vm425_vm3, %v431_v12, 0.0  ;;  %432 = vst.msk [vmem:[%s326_s27] sm:$0xff] %vm425_vm3, %v431_v12  ;;  %v438_v14 = vmul.f32 %v431_v12, %v431_v12 }
  0xf9   : > { %434 = vadd.xlane.f32.xlu0 %v433_v13 }
  0xfa   : > { %v439_v15 = vsel %vm425_vm3, %v438_v14, 0.0 }
  0xfd   : > { %440 = vadd.xlane.f32.xlu0 %v439_v15 }
 0x182   : > { %v435_v16 = vpop.xlane.xlu0 %434 }
 0x183   : > { %437 = vst.msk [vmem:[%s335_s30] sm:$0xff] %vm436_vm4, %v435_v16 }
 0x186   : > { %v441_v17 = vpop.xlane.xlu0 %440 }
 0x187   : > { %442 = vst.msk [vmem:[%s345_s7] sm:$0xff] %vm436_vm4, %v441_v17 }
 0x188 PF: > { %s15_s21 = sadd.s32 1, %s823_s21   ;;  %s969_s10 = sld [smem:[#allocation3_spill]] }
 0x189   : > { %p12_p12 = scmp.ge.s32.totalorder %s15_s21, 26   ;;  %s970_s15 = smov %s811_s18 }
 0x18a   : > { %s971_s16 = smov %s815_s19  ;;  %s972_s17 = smov %s819_s20 }
 0x18b   : > { %s973_s18 = smov %s977_s22  ;;  %s974_s19 = smov %s981_s23 }
 0x18c   :  { %14 = sbr.rel (!%p12_p12) target bundleno = 4 (0x4), region = 93 }
 0x18e   : > { %s975_s20 = smov %s969_s10 }

</bundles_post_ra>
